<compile_context>
chip_gen: v5e
topology: v5e:2x2
jax: 0.10.0
libtpu: 0.0.40
codegen_flags: <defaults>
</compile_context>

<pallas_src>
import functools

import jax
import jax.numpy as jnp
import numpy as np
from jax.experimental import pallas as pl
from jax.experimental.pallas import tpu as pltpu

LATENT = 8
HIDDEN = 128
IN_DIM = 196          # 14 * 14  (flattened by the module's .view(-1, 196))


def _round_up(x, m):
    return ((x + m - 1) // m) * m


def _cdiv(a, b):
    return (a + b - 1) // b


def vae_kernel(x_ref, eps_ref, ew1_ref, eb1_ref, ew2_ref, eb2_ref,
               dw1_ref, db1_ref, dw2_ref, db2_ref,
               recon_ref, enc_ref):
    """One batch tile of the full VAE forward pass.

    x_ref:     (TB, 196)  flattened input, caller's dtype (f32 or bf16)
    eps_ref:   (TB, 8)    reparameterization noise (f32)
    weights:   pre-transposed (in, out), storage_dtype (bf16 default)
    biases:    (1, out) f32
    recon_ref: (TB, 196)  reconstruction, recon_dtype
    enc_ref:   (TB, 16)   fused [mu | logvar], f32
    """
    w_dtype = ew1_ref.dtype

    # ---- Encoder (MXU operands in w_dtype, accumulation in f32) ----
    x = x_ref[...].astype(w_dtype)                                 # in-VMEM cast
    h = jnp.tanh(
        jnp.dot(x, ew1_ref[...], preferred_element_type=jnp.float32)
        + eb1_ref[...])                                            # (TB, 128) f32
    enc = (jnp.dot(h.astype(w_dtype), ew2_ref[...],
                   preferred_element_type=jnp.float32)
           + eb2_ref[...])                                         # (TB, 16) f32
    mu = enc[:, :LATENT]                                           # (TB, 8)
    logvar = enc[:, LATENT:]                                       # (TB, 8)

    # ---- Reparameterize: z = mu + eps * exp(0.5 * logvar)  (f32 elementwise) ----
    std = jnp.exp(0.5 * logvar)
    z = mu + eps_ref[...].astype(jnp.float32) * std                # (TB, 8)

    # ---- Decoder ----
    h2 = jnp.tanh(
        jnp.dot(z.astype(w_dtype), dw1_ref[...],
                preferred_element_type=jnp.float32)
        + db1_ref[...])                                            # (TB, 128)
    logits = (jnp.dot(h2.astype(w_dtype), dw2_ref[...],
                      preferred_element_type=jnp.float32)
              + db2_ref[...])                                      # (TB, 196)
    recon = 0.5 * jnp.tanh(0.5 * logits) + 0.5                     # sigmoid via EUP tanh

    recon_ref[...] = recon.astype(recon_ref.dtype)
    enc_ref[...] = enc


@functools.partial(jax.jit,
                   static_argnames=("block_b", "storage_dtype", "recon_dtype"))
def vautoencoder_forward(x_nchw, params, eps, *, block_b=1024,
                         storage_dtype=jnp.bfloat16,
                         recon_dtype=jnp.float32):
    """x_nchw: (B, ...) with prod(...) == 196. Returns (recon, mu, logvar)."""
    B = x_nchw.shape[0]
    assert int(np.prod(x_nchw.shape[1:])) == IN_DIM, "trailing dims must flatten to 196"
    x2d = jnp.reshape(x_nchw, (B, IN_DIM))              # free view reshape, keep dtype
    if x2d.dtype not in (jnp.bfloat16, jnp.float32):
        x2d = x2d.astype(jnp.float32)

    (ew1, eb1, ew2, eb2, dw1, db1, dw2, db2) = params

    # Weights in storage_dtype (one-time, tiny).  Biases stay f32.
    ew1_s = ew1.astype(storage_dtype)                    # (196, 128)
    ew2_s = ew2.astype(storage_dtype)                    # (128, 16)
    dw1_s = dw1.astype(storage_dtype)                    # (8, 128)
    dw2_s = dw2.astype(storage_dtype)                    # (128, 196)

    # ---- Batch tiling: minimize padding waste, keep >= 2 steps when possible ----
    b8 = _round_up(B, 8)
    n_steps = _cdiv(b8, int(block_b))
    if n_steps == 1 and b8 >= 16:
        n_steps = 2            # shard across v7x's two TCs + enable pipelining
    tb = _round_up(_cdiv(b8, n_steps), 8)
    b_pad = tb * n_steps

    eps_p = eps.astype(jnp.float32)
    x_p = x2d
    if b_pad != B:
        x_p = jnp.pad(x_p, ((0, b_pad - B), (0, 0)))
        eps_p = jnp.pad(eps_p, ((0, b_pad - B), (0, 0)))

    grid = (b_pad // tb,)

    def batch_spec(cols):
        return pl.BlockSpec((tb, cols), lambda i: (i, 0))

    def const_spec(shape):
        return pl.BlockSpec(shape, lambda i: (0, 0))

    out_shapes = (
        jax.ShapeDtypeStruct((b_pad, IN_DIM), recon_dtype),        # recon
        jax.ShapeDtypeStruct((b_pad, 2 * LATENT), jnp.float32),    # [mu | logvar]
    )

    # ---- Cost estimate (helps XLA schedule the custom call) ----
    w_elems = IN_DIM * HIDDEN + HIDDEN * 2 * LATENT + LATENT * HIDDEN + HIDDEN * IN_DIM
    b_elems = HIDDEN + 2 * LATENT + HIDDEN + IN_DIM
    flops = 2 * b_pad * w_elems
    transcendentals = b_pad * (HIDDEN + LATENT + HIDDEN + IN_DIM)  # tanh, exp, tanh, sigmoid
    bytes_accessed = (
        b_pad * IN_DIM * jnp.dtype(x_p.dtype).itemsize            # x read
        + b_pad * LATENT * 4                                      # eps read
        + w_elems * jnp.dtype(storage_dtype).itemsize             # weights
        + b_elems * 4                                             # biases
        + b_pad * IN_DIM * jnp.dtype(recon_dtype).itemsize        # recon write
        + b_pad * 2 * LATENT * 4)                                 # mu|logvar write

    recon_pad, enc = pl.pallas_call(
        vae_kernel,
        out_shape=out_shapes,
        grid=grid,
        in_specs=[
            batch_spec(IN_DIM),                  # x (full-extent 196 lanes)
            batch_spec(LATENT),                  # eps
            const_spec((IN_DIM, HIDDEN)),        # enc.fc1 weight
            const_spec((1, HIDDEN)),             # enc.fc1 bias
            const_spec((HIDDEN, 2 * LATENT)),    # enc.fc2 weight
            const_spec((1, 2 * LATENT)),         # enc.fc2 bias
            const_spec((LATENT, HIDDEN)),        # dec.fc1 weight
            const_spec((1, HIDDEN)),             # dec.fc1 bias
            const_spec((HIDDEN, IN_DIM)),        # dec.fc2 weight
            const_spec((1, IN_DIM)),             # dec.fc2 bias
        ],
        out_specs=(batch_spec(IN_DIM), batch_spec(2 * LATENT)),
        compiler_params=pltpu.CompilerParams(
            dimension_semantics=("parallel",)),
        cost_estimate=pl.CostEstimate(
            flops=flops, transcendentals=transcendentals,
            bytes_accessed=bytes_accessed),
    )(x_p, eps_p, ew1_s, eb1, ew2_s, eb2, dw1_s, db1, dw2_s, db2)

    if b_pad != B:
        recon_pad = recon_pad[:B]
        enc = enc[:B]
    mu = enc[:, :LATENT]
    logvar = enc[:, LATENT:]
    return recon_pad, mu, logvar


def init_params(key):
    """Deterministic init mirroring nn.Linear defaults (U[-1/sqrt(fan_in), +])."""
    def linear(key, fan_in, fan_out):
        kw, kb = jax.random.split(key)
        bound = 1.0 / jnp.sqrt(jnp.float32(fan_in))
        # stored pre-transposed as (in, out) for row-vector matmul
        w = jax.random.uniform(kw, (fan_in, fan_out), jnp.float32, -bound, bound)
        b = jax.random.uniform(kb, (1, fan_out), jnp.float32, -bound, bound)
        return w, b

    k1, k2, k3, k4 = jax.random.split(key, 4)
    ew1, eb1 = linear(k1, IN_DIM, HIDDEN)        # encoder.fc1: 196 -> 128
    ew2, eb2 = linear(k2, HIDDEN, 2 * LATENT)    # encoder.fc2: 128 -> 16
    dw1, db1 = linear(k3, LATENT, HIDDEN)        # decoder.fc1: 8   -> 128
    dw2, db2 = linear(k4, HIDDEN, IN_DIM)        # decoder.fc2: 128 -> 196
    return (ew1, eb1, ew2, eb2, dw1, db1, dw2, db2)


def _reference_forward(x_nchw, params, eps):
    """Pure-JAX f32 reference of the PyTorch forward, for correctness checking."""
    (ew1, eb1, ew2, eb2, dw1, db1, dw2, db2) = params
    x = jnp.reshape(x_nchw, (-1, IN_DIM)).astype(jnp.float32)
    h = jnp.tanh(x @ ew1 + eb1)
    enc = h @ ew2 + eb2
    mu, logvar = enc[:, :LATENT], enc[:, LATENT:]
    z = mu + eps * jnp.exp(0.5 * logvar)
    h2 = jnp.tanh(z @ dw1 + db1)
    recon = jax.nn.sigmoid(h2 @ dw2 + db2)
    return recon, mu, logvar


if __name__ == "__main__":
    key = jax.random.PRNGKey(0)
    kp, kx, keps = jax.random.split(key, 3)

    params = init_params(kp)

    # Small NCHW input: batch=2, 1 channel, 14x14 -> flattens to (2, 196).
    x = jax.random.normal(kx, (2, 1, 14, 14), jnp.float32)
    eps = jax.random.normal(keps, (2, LATENT), jnp.float32)  # torch.randn_like(std)

    r_ref, mu_ref, lv_ref = _reference_forward(x, params, eps)

    # --- Default path: bf16 weight storage / MXU operands (loose tolerance) ---
    recon, mu, logvar = vautoencoder_forward(x, params, eps)
    jax.block_until_ready((recon, mu, logvar))

    assert recon.shape == (2, IN_DIM)
    assert mu.shape == (2, LATENT)
    assert logvar.shape == (2, LATENT)
    assert bool(jnp.all(jnp.isfinite(recon)))
    assert bool(jnp.all((recon >= 0.0) & (recon <= 1.0)))
    assert bool(jnp.allclose(recon, r_ref, atol=5e-2, rtol=5e-2))
    assert bool(jnp.allclose(mu, mu_ref, atol=5e-2, rtol=5e-2))
    assert bool(jnp.allclose(logvar, lv_ref, atol=5e-2, rtol=5e-2))

    # --- f32 storage path: tight numerical check against the reference ---
    recon32, mu32, lv32 = vautoencoder_forward(
        x, params, eps, storage_dtype=jnp.float32)
    jax.block_until_ready((recon32, mu32, lv32))
    assert bool(jnp.allclose(recon32, r_ref, atol=1e-4, rtol=1e-4))
    assert bool(jnp.allclose(mu32, mu_ref, atol=1e-4, rtol=1e-4))
    assert bool(jnp.allclose(lv32, lv_ref, atol=1e-4, rtol=1e-4))

    print("KERNEL_OK")
</pallas_src>

<mosaic_0001>
module attributes {stable_mosaic.version = 11 : i64} {
  func.func @vae_kernel(%arg0: i32, %arg1: memref<8x196xf32, #tpu.memory_space<vmem>>, %arg2: memref<8x8xf32, #tpu.memory_space<vmem>>, %arg3: memref<196x128xbf16, #tpu.memory_space<vmem>>, %arg4: memref<1x128xf32, #tpu.memory_space<vmem>>, %arg5: memref<128x16xbf16, #tpu.memory_space<vmem>>, %arg6: memref<1x16xf32, #tpu.memory_space<vmem>>, %arg7: memref<8x128xbf16, #tpu.memory_space<vmem>>, %arg8: memref<1x128xf32, #tpu.memory_space<vmem>>, %arg9: memref<128x196xbf16, #tpu.memory_space<vmem>>, %arg10: memref<1x196xf32, #tpu.memory_space<vmem>>, %arg11: memref<8x196xf32, #tpu.memory_space<vmem>>, %arg12: memref<8x16xf32, #tpu.memory_space<vmem>>) attributes {dimension_semantics = [#tpu.dimension_semantics<parallel>], iteration_bounds = array<i64: 1>, scalar_prefetch = 0 : i64, scratch_operands = 0 : i64, tpu.core_type = #tpu.core_type<tc>, window_params = [{transform_indices = @transform_0, window_bounds = array<i64: 8, 196>}, {transform_indices = @transform_1, window_bounds = array<i64: 8, 8>}, {pipeline_mode = #tpu.pipeline_mode<synchronous>, transform_indices = @transform_2, window_bounds = array<i64: 196, 128>}, {pipeline_mode = #tpu.pipeline_mode<synchronous>, transform_indices = @transform_3, window_bounds = array<i64: 1, 128>}, {pipeline_mode = #tpu.pipeline_mode<synchronous>, transform_indices = @transform_4, window_bounds = array<i64: 128, 16>}, {pipeline_mode = #tpu.pipeline_mode<synchronous>, transform_indices = @transform_5, window_bounds = array<i64: 1, 16>}, {pipeline_mode = #tpu.pipeline_mode<synchronous>, transform_indices = @transform_6, window_bounds = array<i64: 8, 128>}, {pipeline_mode = #tpu.pipeline_mode<synchronous>, transform_indices = @transform_7, window_bounds = array<i64: 1, 128>}, {pipeline_mode = #tpu.pipeline_mode<synchronous>, transform_indices = @transform_8, window_bounds = array<i64: 128, 196>}, {pipeline_mode = #tpu.pipeline_mode<synchronous>, transform_indices = @transform_9, window_bounds = array<i64: 1, 196>}, {transform_indices = @transform_10, window_bounds = array<i64: 8, 196>}, {transform_indices = @transform_11, window_bounds = array<i64: 8, 16>}]} {
    %c0 = arith.constant 0 : index
    %c0_0 = arith.constant 0 : index
    %0 = vector.load %arg1[%c0, %c0_0] : memref<8x196xf32, #tpu.memory_space<vmem>>, vector<8x196xf32>
    %1 = arith.truncf %0 : vector<8x196xf32> to vector<8x196xbf16>
    %c0_1 = arith.constant 0 : index
    %c0_2 = arith.constant 0 : index
    %2 = vector.load %arg3[%c0_1, %c0_2] : memref<196x128xbf16, #tpu.memory_space<vmem>>, vector<196x128xbf16>
    %cst = arith.constant dense<0.000000e+00> : vector<8x128xf32>
    %3 = tpu.matmul %1, %2, %cst {dimension_numbers = #tpu.dot_dimension_numbers<[1], [0], [0], [1], [0, 0, 1, 1], [], []>} : vector<8x196xbf16>, vector<196x128xbf16>, vector<8x128xf32> -> vector<8x128xf32>
    %c0_3 = arith.constant 0 : index
    %c0_4 = arith.constant 0 : index
    %4 = vector.load %arg4[%c0_3, %c0_4] : memref<1x128xf32, #tpu.memory_space<vmem>>, vector<1x128xf32>
    %5 = vector.broadcast %4 : vector<1x128xf32> to vector<8x128xf32>
    %6 = arith.addf %3, %5 : vector<8x128xf32>
    %7 = math.tanh %6 : vector<8x128xf32>
    %8 = arith.truncf %7 : vector<8x128xf32> to vector<8x128xbf16>
    %c0_5 = arith.constant 0 : index
    %c0_6 = arith.constant 0 : index
    %9 = vector.load %arg5[%c0_5, %c0_6] : memref<128x16xbf16, #tpu.memory_space<vmem>>, vector<128x16xbf16>
    %cst_7 = arith.constant dense<0.000000e+00> : vector<8x16xf32>
    %10 = tpu.matmul %8, %9, %cst_7 {dimension_numbers = #tpu.dot_dimension_numbers<[1], [0], [0], [1], [0, 0, 1, 1], [], []>} : vector<8x128xbf16>, vector<128x16xbf16>, vector<8x16xf32> -> vector<8x16xf32>
    %c0_8 = arith.constant 0 : index
    %c0_9 = arith.constant 0 : index
    %11 = vector.load %arg6[%c0_8, %c0_9] : memref<1x16xf32, #tpu.memory_space<vmem>>, vector<1x16xf32>
    %12 = vector.broadcast %11 : vector<1x16xf32> to vector<8x16xf32>
    %13 = arith.addf %10, %12 : vector<8x16xf32>
    %14 = vector.extract_strided_slice %13 {offsets = [0, 0], sizes = [8, 8], strides = [1, 1]} : vector<8x16xf32> to vector<8x8xf32>
    %15 = vector.extract_strided_slice %13 {offsets = [0, 8], sizes = [8, 8], strides = [1, 1]} : vector<8x16xf32> to vector<8x8xf32>
    %cst_10 = arith.constant 5.000000e-01 : f32
    %16 = vector.broadcast %cst_10 : f32 to vector<8x8xf32>
    %17 = arith.mulf %16, %15 : vector<8x8xf32>
    %18 = math.exp %17 : vector<8x8xf32>
    %c0_11 = arith.constant 0 : index
    %c0_12 = arith.constant 0 : index
    %19 = vector.load %arg2[%c0_11, %c0_12] : memref<8x8xf32, #tpu.memory_space<vmem>>, vector<8x8xf32>
    %20 = arith.mulf %19, %18 : vector<8x8xf32>
    %21 = arith.addf %14, %20 : vector<8x8xf32>
    %22 = arith.truncf %21 : vector<8x8xf32> to vector<8x8xbf16>
    %c0_13 = arith.constant 0 : index
    %c0_14 = arith.constant 0 : index
    %23 = vector.load %arg7[%c0_13, %c0_14] : memref<8x128xbf16, #tpu.memory_space<vmem>>, vector<8x128xbf16>
    %cst_15 = arith.constant dense<0.000000e+00> : vector<8x128xf32>
    %24 = tpu.matmul %22, %23, %cst_15 {dimension_numbers = #tpu.dot_dimension_numbers<[1], [0], [0], [1], [0, 0, 1, 1], [], []>} : vector<8x8xbf16>, vector<8x128xbf16>, vector<8x128xf32> -> vector<8x128xf32>
    %c0_16 = arith.constant 0 : index
    %c0_17 = arith.constant 0 : index
    %25 = vector.load %arg8[%c0_16, %c0_17] : memref<1x128xf32, #tpu.memory_space<vmem>>, vector<1x128xf32>
    %26 = vector.broadcast %25 : vector<1x128xf32> to vector<8x128xf32>
    %27 = arith.addf %24, %26 : vector<8x128xf32>
    %28 = math.tanh %27 : vector<8x128xf32>
    %29 = arith.truncf %28 : vector<8x128xf32> to vector<8x128xbf16>
    %c0_18 = arith.constant 0 : index
    %c0_19 = arith.constant 0 : index
    %30 = vector.load %arg9[%c0_18, %c0_19] : memref<128x196xbf16, #tpu.memory_space<vmem>>, vector<128x196xbf16>
    %cst_20 = arith.constant dense<0.000000e+00> : vector<8x196xf32>
    %31 = tpu.matmul %29, %30, %cst_20 {dimension_numbers = #tpu.dot_dimension_numbers<[1], [0], [0], [1], [0, 0, 1, 1], [], []>} : vector<8x128xbf16>, vector<128x196xbf16>, vector<8x196xf32> -> vector<8x196xf32>
    %c0_21 = arith.constant 0 : index
    %c0_22 = arith.constant 0 : index
    %32 = vector.load %arg10[%c0_21, %c0_22] : memref<1x196xf32, #tpu.memory_space<vmem>>, vector<1x196xf32>
    %33 = vector.broadcast %32 : vector<1x196xf32> to vector<8x196xf32>
    %34 = arith.addf %31, %33 : vector<8x196xf32>
    %cst_23 = arith.constant 5.000000e-01 : f32
    %35 = vector.broadcast %cst_23 : f32 to vector<8x196xf32>
    %36 = arith.mulf %35, %34 : vector<8x196xf32>
    %37 = math.tanh %36 : vector<8x196xf32>
    %cst_24 = arith.constant 5.000000e-01 : f32
    %38 = vector.broadcast %cst_24 : f32 to vector<8x196xf32>
    %39 = arith.mulf %38, %37 : vector<8x196xf32>
    %cst_25 = arith.constant 5.000000e-01 : f32
    %40 = vector.broadcast %cst_25 : f32 to vector<8x196xf32>
    %41 = arith.addf %39, %40 : vector<8x196xf32>
    %c0_26 = arith.constant 0 : index
    %c0_27 = arith.constant 0 : index
    %42 = vector.load %arg11[%c0_26, %c0_27] : memref<8x196xf32, #tpu.memory_space<vmem>>, vector<8x196xf32>
    tpu.vector_store %arg11[%c0_26, %c0_27], %41 {strides = array<i32>} : memref<8x196xf32, #tpu.memory_space<vmem>>, vector<8x196xf32>,
    %c0_28 = arith.constant 0 : index
    %c0_29 = arith.constant 0 : index
    %43 = vector.load %arg12[%c0_28, %c0_29] : memref<8x16xf32, #tpu.memory_space<vmem>>, vector<8x16xf32>
    tpu.vector_store %arg12[%c0_28, %c0_29], %13 {strides = array<i32>} : memref<8x16xf32, #tpu.memory_space<vmem>>, vector<8x16xf32>,
    return
  }
  func.func @transform_0(%arg0: i32) -> (i32, i32) {
    %c0_i32 = arith.constant 0 : i32
    %c0_i32_0 = arith.constant 0 : i32
    return %arg0, %c0_i32 : i32, i32
  }
  func.func @transform_1(%arg0: i32) -> (i32, i32) {
    %c0_i32 = arith.constant 0 : i32
    %c0_i32_0 = arith.constant 0 : i32
    return %arg0, %c0_i32 : i32, i32
  }
  func.func @transform_2(%arg0: i32) -> (i32, i32) {
    %c0_i32 = arith.constant 0 : i32
    %c0_i32_0 = arith.constant 0 : i32
    %c0_i32_1 = arith.constant 0 : i32
    return %c0_i32, %c0_i32_0 : i32, i32
  }
  func.func @transform_3(%arg0: i32) -> (i32, i32) {
    %c0_i32 = arith.constant 0 : i32
    %c0_i32_0 = arith.constant 0 : i32
    %c0_i32_1 = arith.constant 0 : i32
    return %c0_i32, %c0_i32_0 : i32, i32
  }
  func.func @transform_4(%arg0: i32) -> (i32, i32) {
    %c0_i32 = arith.constant 0 : i32
    %c0_i32_0 = arith.constant 0 : i32
    %c0_i32_1 = arith.constant 0 : i32
    return %c0_i32, %c0_i32_0 : i32, i32
  }
  func.func @transform_5(%arg0: i32) -> (i32, i32) {
    %c0_i32 = arith.constant 0 : i32
    %c0_i32_0 = arith.constant 0 : i32
    %c0_i32_1 = arith.constant 0 : i32
    return %c0_i32, %c0_i32_0 : i32, i32
  }
  func.func @transform_6(%arg0: i32) -> (i32, i32) {
    %c0_i32 = arith.constant 0 : i32
    %c0_i32_0 = arith.constant 0 : i32
    %c0_i32_1 = arith.constant 0 : i32
    return %c0_i32, %c0_i32_0 : i32, i32
  }
  func.func @transform_7(%arg0: i32) -> (i32, i32) {
    %c0_i32 = arith.constant 0 : i32
    %c0_i32_0 = arith.constant 0 : i32
    %c0_i32_1 = arith.constant 0 : i32
    return %c0_i32, %c0_i32_0 : i32, i32
  }
  func.func @transform_8(%arg0: i32) -> (i32, i32) {
    %c0_i32 = arith.constant 0 : i32
    %c0_i32_0 = arith.constant 0 : i32
    %c0_i32_1 = arith.constant 0 : i32
    return %c0_i32, %c0_i32_0 : i32, i32
  }
  func.func @transform_9(%arg0: i32) -> (i32, i32) {
    %c0_i32 = arith.constant 0 : i32
    %c0_i32_0 = arith.constant 0 : i32
    %c0_i32_1 = arith.constant 0 : i32
    return %c0_i32, %c0_i32_0 : i32, i32
  }
  func.func @transform_10(%arg0: i32) -> (i32, i32) {
    %c0_i32 = arith.constant 0 : i32
    %c0_i32_0 = arith.constant 0 : i32
    return %arg0, %c0_i32 : i32, i32
  }
  func.func @transform_11(%arg0: i32) -> (i32, i32) {
    %c0_i32 = arith.constant 0 : i32
    %c0_i32_0 = arith.constant 0 : i32
    return %arg0, %c0_i32 : i32, i32
  }
}

</mosaic_0001>

<bundles_post_ra>
// kernel: vautoencoder_forward.1
= control target key start
LH: loop header
LB: loop body
LE: loop exit
PB: predicated region body
PF: predicated region fallthrough
CT: control target
= control target key end

     0   :  { %vm150_vm0 = vcmask 1041408   ;;  %vm146_vm1 = vcmask 556032   ;;  %vm440_vm2 = vcmask 130048   ;;  %vm283_vm3 = vcmask 1043456   ;;  %s901_s2 = inlined_call_operand.vmem [shape: bf16[196,128], index: 2, kind: input, shape index: {}]   ;;  %s902_s4 = inlined_call_operand.vmem [shape: bf16[128,16], index: 4, kind: input, shape index: {}]   ;;  %s903_s0 = inlined_call_operand.vmem [shape: f32[8,196], index: 0, kind: input, shape index: {}]   ;;  %s904_s3 = inlined_call_operand.vmem [shape: f32[1,128], index: 3, kind: input, shape index: {}]   ;;  %s905_s5 = inlined_call_operand.vmem [shape: f32[1,16], index: 5, kind: input, shape index: {}]   ;;  %s906_s11 = inlined_call_operand.vmem [shape: f32[8,16], index: 11, kind: output, shape index: {1}]   ;;  %s907_s7 = inlined_call_operand.vmem [shape: f32[1,128], index: 7, kind: input, shape index: {}]   ;;  %s908_s6 = inlined_call_operand.vmem [shape: bf16[8,128], index: 6, kind: input, shape index: {}]   ;;  %s909_s8 = inlined_call_operand.vmem [shape: bf16[128,196], index: 8, kind: input, shape index: {}]   ;;  %s910_s1 = inlined_call_operand.vmem [shape: f32[8,8], index: 1, kind: input, shape index: {}]   ;;  %s911_s9 = inlined_call_operand.vmem [shape: f32[1,196], index: 9, kind: input, shape index: {}]   ;;  %s912_s10 = inlined_call_operand.vmem [shape: f32[8,196], index: 10, kind: output, shape index: {0}]  }
   0x1   :  { %v603_v0 = vld [vmem:[%s901_s2 + $0x38] sm:$0xff]  ;;  %v66_v1 = vld [vmem:[%s901_s2 + $0x60] sm:$0x3]  ;;  %v602_v3 = vld [vmem:[%s901_s2 + $0x30] sm:$0xff]  ;;  %vm279_vm4 = vcmask 64512  }
   0x2   :  { %v120_v2 = vunpack.c.l.b16 %v66_v1  ;;  %154 = vmatpush.bf16.msra.mxu0 %v603_v0  ;;  %v615_v6 = vld [vmem:[%s902_s4 + $0x38] sm:$0xff]  ;;  %v601_v7 = vld [vmem:[%s901_s2 + $0x28] sm:$0xff]  ;;  %v614_v9 = vld [vmem:[%s902_s4 + $0x30] sm:$0xff] }
   0x3   :  { %v607_v8 = vld [vmem:[%s901_s2 + $0x58] sm:$0xff]  ;;  %250 = vmatpush.bf16.msra.mxu2 %v615_v6  ;;  %v600_v10 = vld [vmem:[%s901_s2 + $0x20] sm:$0xff]  ;;  %v606_v11 = vld [vmem:[%s901_s2 + $0x50] sm:$0xff] }
   0x4   :  { %v133_v4 = vpack.c.b16 %v120_v2, %v120_v2  ;;  %v613_v12 = vld [vmem:[%s902_s4 + $0x28] sm:$0xff]  ;;  %v599_v13 = vld [vmem:[%s901_s2 + $0x18] sm:$0xff]  ;;  %v598_v15 = vld [vmem:[%s901_s2 + $0x10] sm:$0xff] }
   0x5   :  { %v605_v14 = vld [vmem:[%s901_s2 + $0x48] sm:$0xff]  ;;  %v604_v16 = vld [vmem:[%s901_s2 + $0x40] sm:$0xff]  ;;  %v611_v24 = vld [vmem:[%s902_s4 + $0x18] sm:$0xff] }
   0x6   :  { %v152_v5 = vsel %vm150_vm0, %v133_v4, 0  ;;  %155 = vmatpush.bf16.msra.mxu0 %v602_v3  ;;  %v39_v17 = vld [vmem:[%s903_s0 + $0x8] sm:$0xff]  ;;  %v596_v20 = vld [vmem:[%s901_s2] sm:$0xff]  ;;  %v610_v25 = vld [vmem:[%s902_s4 + $0x10] sm:$0xff] }
   0x7   :  { %170 = vmatpush.bf16.msra.mxu1 %v152_v5  ;;  %251 = vmatpush.bf16.msra.mxu2 %v614_v9  ;;  %v41_v18 = vpack.c.bf16 %v39_v17, %v39_v17  ;;  %v597_v19 = vld [vmem:[%s901_s2 + $0x8] sm:$0xff]  ;;  %v38_v21 = vld [vmem:[%s903_s0] sm:$0xff]  ;;  %v590_v46 = vld [vmem:[%s909_s8 + $0x70] sm:$0xf] }
   0x8   :  { %v40_v22 = vpack.c.bf16 %v38_v21, %v38_v21  ;;  %v612_v23 = vld [vmem:[%s902_s4 + $0x20] sm:$0xff]  ;;  %v609_v26 = vld [vmem:[%s902_s4 + $0x8] sm:$0xff]  ;;  %v631_v47 = vld [vmem:[%s909_s8 + $0x74] sm:$0xf0] }
   0x9   :  { %v608_v27 = vld [vmem:[%s902_s4] sm:$0xff]  ;;  %v630_v48 = vld [vmem:[%s909_s8 + $0x74] sm:$0xf]  ;;  %v591_v49 = vor.u32 %v631_v47, %v590_v46  ;;  %v592_v50 = vld [vmem:[%s909_s8 + $0x78] sm:$0xf0] }
   0xa   :  { %156 = vmatpush.bf16.msra.mxu0 %v601_v7  ;;  %v633_v29 = vld [vmem:[%s904_s3] ss:$0 sm:$0xff]  ;;  %s646_s3 = smov 120   ;;  %v629_v52 = vld [vmem:[%s909_s8 + $0x64] sm:$0xf0]  ;;  %v595_v53 = vor.u32 %v630_v48, %v592_v50 }
   0xb   :  { %171 = vmatpush.bf16.msra.mxu1 %v607_v8  ;;  %252 = vmatpush.bf16.msra.mxu2 %v613_v12  ;;  %v634_v37 = vld [vmem:[%s905_s5] ss:$0 sm:$0xff]  ;;  %v628_v54 = vld [vmem:[%s909_s8 + $0x64] sm:$0xf]  ;;  %v584_v55 = vld [vmem:[%s909_s8 + $0x68] sm:$0xf0] }
   0xc   :  { %v274_v44 = vld [vmem:[%s908_s6] sm:$0xf]  ;;  %v587_v57 = vor.u32 %v628_v54, %v584_v55  ;;  %v574_v58 = vld [vmem:[%s909_s8 + $0x50] sm:$0xf]  ;;  %v627_v59 = vld [vmem:[%s909_s8 + $0x54] sm:$0xf0] }
   0xd   :  { %v285_v45 = vsel %vm283_vm3, %v274_v44, 0  ;;  %v582_v51 = vld [vmem:[%s909_s8 + $0x60] sm:$0xf]  ;;  %v626_v60 = vld [vmem:[%s909_s8 + $0x54] sm:$0xf]  ;;  %v575_v62 = vor.u32 %v627_v59, %v574_v58 }
   0xe   :  { %157 = vmatpush.bf16.msra.mxu0 %v600_v10  ;;  %294 = vmatpush.bf16.msra.mxu3 %v285_v45  ;;  %v583_v56 = vor.u32 %v629_v52, %v582_v51  ;;  %v576_v61 = vld [vmem:[%s909_s8 + $0x58] sm:$0xf0]  ;;  %v566_v0 = vld [vmem:[%s909_s8 + $0x40] sm:$0xf]  ;;  %v625_v1 = vld [vmem:[%s909_s8 + $0x44] sm:$0xf0] }
   0xf   :  { %172 = vmatpush.bf16.msra.mxu1 %v606_v11  ;;  %253 = vmatpush.bf16.msra.mxu2 %v612_v23  ;;  %v579_v63 = vor.u32 %v626_v60, %v576_v61  ;;  %v624_v2 = vld [vmem:[%s909_s8 + $0x44] sm:$0xf]  ;;  %v568_v3 = vld [vmem:[%s909_s8 + $0x48] sm:$0xf0]  ;;  %v567_v4 = vor.u32 %v625_v1, %v566_v0  ;;  %v558_v6 = vld [vmem:[%s909_s8 + $0x30] sm:$0xf] }
  0x10   :  { %v571_v5 = vor.u32 %v624_v2, %v568_v3  ;;  %v623_v7 = vld [vmem:[%s909_s8 + $0x34] sm:$0xf0]  ;;  %v622_v8 = vld [vmem:[%s909_s8 + $0x34] sm:$0xf]  ;;  %v560_v9 = vld [vmem:[%s909_s8 + $0x38] sm:$0xf0] }
  0x11   :  { %v559_v10 = vor.u32 %v623_v7, %v558_v6  ;;  %v563_v11 = vor.u32 %v622_v8, %v560_v9  ;;  %v266_v12 = vld [vmem:[%s910_s1] sm:$0xff]  ;;  %v552_v21 = vld [vmem:[%s909_s8 + $0x28] sm:$0xf0]  ;;  %v542_v23 = vld [vmem:[%s909_s8 + $0x10] sm:$0xf] }
  0x12   :  { %158 = vmatpush.bf16.msra.mxu0 %v599_v13  ;;  %404 = vmatpush.bf16.msrb.mxu3 %v591_v49  ;;  %v550_v17 = vld [vmem:[%s909_s8 + $0x20] sm:$0xf] }
  0x13   :  { %173 = vmatpush.bf16.msra.mxu1 %v605_v14  ;;  %254 = vmatpush.bf16.msra.mxu2 %v611_v24  ;;  %v619_v24 = vld [vmem:[%s909_s8 + $0x14] sm:$0xf0] }
  0x16   :  { %159 = vmatpush.bf16.msra.mxu0 %v598_v15  ;;  %405 = vmatpush.bf16.msrb.mxu3 %v583_v56 }
  0x17   :  { %174 = vmatpush.bf16.msra.mxu1 %v604_v16  ;;  %255 = vmatpush.bf16.msra.mxu2 %v610_v25  ;;  %v618_v25 = vld [vmem:[%s909_s8 + $0x14] sm:$0xf] }
  0x1a   :  { %498 = vmatmul.msk.bf16.vlgmr.msra.gmra.mxu1 %vm146_vm1, %v41_v18  ;;  %160 = vmatpush.bf16.msra.mxu0 %v597_v19  ;;  %v621_v18 = vld [vmem:[%s909_s8 + $0x24] sm:$0xf0]  ;;  %v620_v19 = vld [vmem:[%s909_s8 + $0x24] sm:$0xf] }
  0x1b   :  { %256 = vmatpush.bf16.msra.mxu2 %v609_v26  ;;  %417 = vmatpush.bf16.msrb.mxu1 %v595_v53  ;;  %v543_v26 = vor.u32 %v619_v24, %v542_v23 }
  0x1c   :  { %406 = vmatpush.bf16.msrb.mxu3 %v575_v62 }
  0x1e   :  { %161 = vmatpush.bf16.msra.mxu0 %v596_v20  ;;  %v551_v20 = vor.u32 %v621_v18, %v550_v17 }
  0x1f   :  { %257 = vmatpush.bf16.msra.mxu2 %v608_v27  ;;  %418 = vmatpush.bf16.msrb.mxu1 %v587_v57  ;;  %v544_v27 = vld [vmem:[%s909_s8 + $0x18] sm:$0xf0] }
  0x20   :  { %407 = vmatpush.bf16.msrb.mxu3 %v567_v4 }
  0x21   :  { %162 = vmatmul.bf16.vlgmr.msra.gmra.mxu0 %v40_v22  ;;  %v555_v22 = vor.u32 %v620_v19, %v552_v21 }
  0x23   :  { %419 = vmatpush.bf16.msrb.mxu1 %v579_v63 }
  0x24   :  { %408 = vmatpush.bf16.msrb.mxu3 %v559_v10 }
  0x27   :  { %420 = vmatpush.bf16.msrb.mxu1 %v571_v5 }
  0x28   :  { %409 = vmatpush.bf16.msrb.mxu3 %v551_v20 }
  0x2b   :  { %421 = vmatpush.bf16.msrb.mxu1 %v563_v11 }
  0x2c   :  { %410 = vmatpush.bf16.msrb.mxu3 %v543_v26 }
  0x2f   :  { %422 = vmatpush.bf16.msrb.mxu1 %v555_v22 }
  0x97   :  { %v176_v28 = vpop.f32.mrf.mxu1 }
  0x9e   :  { %v163_v30 = vpop.f32.mrf.mxu0 }
  0x9f   :  { %v178_v31 = vpop.f32.mrf.mxu1  ;;  %v164_v32 = vadd.f32 %v633_v29, %v163_v30  ;;  %v534_v29 = vld [vmem:[%s909_s8] sm:$0xf]  ;;  %v617_v30 = vld [vmem:[%s909_s8 + $0x4] sm:$0xf0] }
  0xa0   :  { %v616_v31 = vld [vmem:[%s909_s8 + $0x4] sm:$0xf] }
  0xa1   :  { %v177_v33 = vadd.f32 %v176_v28, %v164_v32  ;;  %v547_v28 = vor.u32 %v618_v25, %v544_v27  ;;  %v535_v32 = vor.u32 %v617_v30, %v534_v29 }
  0xa3   :  { %636 = vtanh.f32 %v177_v33  ;;  %423 = vmatpush.bf16.msrb.mxu1 %v547_v28  ;;  %v536_v33 = vld [vmem:[%s909_s8 + $0x8] sm:$0xf0]  ;;  %411 = vmatpush.bf16.msrb.mxu3 %v535_v32 }
  0xa6   :  { %v165_v34 = vpop.f32.mrf.mxu0 }
  0xa7   :  { %v539_v34 = vor.u32 %v616_v31, %v536_v33 }
  0xa9   :  { %v637_v35 = vpop.eup %636  ;;  %424 = vmatpush.bf16.msrb.mxu1 %v539_v34 }
  0xaa   :  { %v181_v36 = vpack.c.bf16 %v637_v35, %v637_v35  ;;  %v635_v35 = vld [vmem:[%s907_s7] ss:$0 sm:$0xff] }
  0xac   :  { %258 = vmatmul.bf16.vlgmr.msra.gmra.mxu2 %v181_v36 }
 0x12f   :  { %v259_v38 = vpop.f32.mrf.mxu2 }
 0x130   :  { %v260_v39 = vadd.f32 %v634_v37, %v259_v38 }
 0x132   :  { %v263_v40 = vmul.f32 0.5, %v260_v39  ;;  %441 = vst.msk [vmem:[%s906_s11] sm:$0xff] %vm440_vm2, %v260_v39 }
 0x134   :  { %v264_v41 = vmul.f32 1.442695, %v263_v40 }
 0x136   :  { %638 = vpow2.f32 %v264_v41  ;;  %v318_v41 = vld [vmem:[%s911_s9] sm:$0x3] }
 0x137   :  { %v261_v42 = vpop.f32.mrf.mxu2  ;;  %v320_v46 = vperm.slane %v318_v41, 0 }
 0x138   :  { %v321_v42 = vperm.slane %v318_v41, 1 }
 0x13c   :  { %v639_v43 = vpop.eup %638 }
 0x13d   :  { %268 = vrot.lane.b32.xlu0 %v639_v43, %s646_s3 }
 0x1af   :  { %v269_v13 = vpop.permute.xlu0 %268 }
 0x1b0   :  { %v271_v14 = vmul.f32 %v269_v13, %v266_v12 }
 0x1b2   :  { %v272_v15 = vadd.f32 %v271_v14, %v260_v39 }
 0x1b4   :  { %v273_v16 = vpack.c.bf16 %v272_v15, %v272_v15 }
 0x1b6   :  { %531 = vmatmul.msk.bf16.vlgmr.msra.gmra.mxu3 %vm279_vm4, %v273_v16 }
 0x239   :  { %v296_v36 = vpop.f32.mrf.mxu3 }
 0x23a   :  { %v297_v37 = vadd.f32 %v635_v35, %v296_v36 }
 0x23c   :  { %640 = vtanh.f32 %v297_v37 }
 0x241   :  { %v298_v38 = vpop.f32.mrf.mxu3 }
 0x242   :  { %v641_v39 = vpop.eup %640 }
 0x243   :  { %v301_v40 = vpack.c.bf16 %v641_v39, %v641_v39 }
 0x245   :  { %412 = vmatmul.bf16.vlgmr.msrb.gmra.mxu3 %v301_v40  ;;  %425 = vmatmul.bf16.vlgmr.msrb.gmra.mxu1 %v301_v40 }
 0x2c2   :  { %v426_v43 = vpop.f32.mrf.mxu1 }
 0x2c3   :  { %v427_v44 = vadd.f32 %v426_v43, %v321_v42 }
 0x2c5   :  { %v431_v45 = vmul.f32 0.5, %v427_v44 }
 0x2c7   :  { %642 = vtanh.f32 %v431_v45 }
 0x2c8   :  { %v413_v47 = vpop.f32.mrf.mxu3 }
 0x2c9   :  { %v414_v48 = vadd.f32 %v413_v47, %v320_v46 }
 0x2ca   :  { %v428_v49 = vpop.f32.mrf.mxu1 }
 0x2cb   :  { %v430_v50 = vmul.f32 0.5, %v414_v48 }
 0x2cd   :  { %v643_v51 = vpop.eup %642  ;;  %644 = vtanh.f32 %v430_v50 }
 0x2ce   :  { %v435_v52 = vmul.f32 0.5, %v643_v51 }
 0x2d0   :  { %v437_v53 = vadd.f32 0.5, %v435_v52  ;;  %v415_v54 = vpop.f32.mrf.mxu3 }
 0x2d2   :  { %439 = vst.msk [vmem:[%s912_s10 + $0x8] sm:$0xff] %vm146_vm1, %v437_v53 }
 0x2d3   :  { %v645_v55 = vpop.eup %644 }
 0x2d4   :  { %v434_v56 = vmul.f32 0.5, %v645_v55 }
 0x2d6   :  { %v436_v57 = vadd.f32 0.5, %v434_v56 }
 0x2d8   :  { %438 = vst [vmem:[%s912_s10] sm:$0xff] %v436_v57 }

</bundles_post_ra>
